<compile_context>
chip_gen: v7x
topology: tpu7x:2x2x1
jax: 0.10.0
libtpu: 0.0.40
codegen_flags: <defaults>
</compile_context>

<pallas_src>
import numpy as np
import jax
import jax.numpy as jnp
from jax.experimental import pallas as pl
from jax.experimental.pallas import tpu as pltpu

_CLIP_MEAN = (0.48145466, 0.4578275, 0.40821073)
_CLIP_STD = (0.26862954, 0.26130258, 0.27577711)
LANE = 128
VMEM_LIMIT_BYTES = 32 * 1024 * 1024  # explicit scoped-VMEM limit (<= physical on v5e..v7x)


# --------------------------------------------------------------------------
# Glue: separable bicubic interpolation matrix (align_corners=False, a=-0.75)
# --------------------------------------------------------------------------
def bicubic_weight_matrix(out_size: int, in_size: int, a: float = -0.75) -> np.ndarray:
    def cubic(t):
        t = abs(t)
        if t <= 1.0:
            return (a + 2.0) * t ** 3 - (a + 3.0) * t ** 2 + 1.0
        if t < 2.0:
            return a * t ** 3 - 5.0 * a * t ** 2 + 8.0 * a * t - 4.0 * a
        return 0.0

    W = np.zeros((out_size, in_size), dtype=np.float32)
    scale = in_size / out_size
    for i in range(out_size):
        src = (i + 0.5) * scale - 0.5
        f = int(np.floor(src))
        frac = src - f
        for k in range(-1, 3):
            idx = min(max(f + k, 0), in_size - 1)  # border replicate
            W[i, idx] += cubic(k - frac)
    return W


# --------------------------------------------------------------------------
# Generation-aware grid split helpers
# --------------------------------------------------------------------------
def _num_tensorcores() -> int:
    """Best-effort TensorCore count of device 0 (v4/v5p/v7x have 2 per chip)."""
    try:
        dev = jax.devices()[0]
        n = getattr(dev, "num_cores", None)
        if n:
            return int(n)
        kind = str(getattr(dev, "device_kind", "")).lower()
        if "lite" in kind or "v5e" in kind or "v6e" in kind:
            return 1
        if any(t in kind for t in ("v4", "v5", "v7")):
            return 2
    except Exception:
        pass
    return 1


def _grid_split(n, bytes_per_item, *, n_cores, min_block=1,
                block_budget_bytes=8 * 1024 * 1024, steps_per_core=2):
    """Pick (num_blocks, items_per_block) for a 1-D 'parallel' batch grid.

    - block size is capped so a double-buffered block stays inside a VMEM budget,
    - multi-core parts aim for >= steps_per_core grid steps per TensorCore so input
      DMA pipelines against compute,
    - single-core parts keep small batches in a single step (serial grid, ~0.35us/step),
    - min_block keeps split block shapes (8,128)-legal where needed.
    """
    nb = min(n, max(1, block_budget_bytes // max(1, 2 * bytes_per_item)))
    if n_cores > 1:
        nb = min(nb, max(1, -(-n // (n_cores * steps_per_core))))
    if nb >= n:
        return 1, n
    nb = max(min_block, -(-nb // min_block) * min_block)
    if nb >= n:
        return 1, n
    return -(-n // nb), nb


def _weight_spec(shape, single_buffer):
    """Grid-invariant operand: constant index map; optionally single-buffered
    (the pipeline's second buffer is never used when the index map is constant)."""
    index_map = lambda b: (0,) * len(shape)
    if single_buffer and hasattr(pl, "Buffered"):
        try:
            return pl.BlockSpec(shape, index_map, pipeline_mode=pl.Buffered(1))
        except TypeError:  # JAX build without BlockSpec(pipeline_mode=...)
            pass
    return pl.BlockSpec(shape, index_map)


# --------------------------------------------------------------------------
# Kernel 1: preprocess = bicubic resize (batched matmuls) + CLIP normalize.
#           Data is channel-major (C, N, H, W) so the per-channel store is a
#           plain leading-index write.
# --------------------------------------------------------------------------
def _preprocess_kernel(x_ref, wwt_ref, wh_ref, o_ref):
    C, nb, H, W = x_ref.shape
    R = wh_ref.shape[0]
    # Column (W -> R) resize as ONE big matmul: M = C*nb*H keeps the MXU pipeline full.
    x2 = x_ref[...].reshape(C * nb * H, W)                                   # bf16
    y = jnp.dot(x2, wwt_ref[...], preferred_element_type=jnp.float32)       # (C*nb*H, R)
    # Row (H -> R) resize as a single batched matmul over the C*nb images.
    y3 = y.astype(jnp.bfloat16).reshape(C * nb, H, R)
    wh_b = jnp.broadcast_to(wh_ref[...], (C * nb, R, H))
    z = jnp.einsum("bri,bis->brs", wh_b, y3,
                   preferred_element_type=jnp.float32).reshape(C, nb, R, R)
    # CLIP per-channel normalization; constants baked at trace time (VPU only).
    for c in range(C):  # C == 3, static
        o_ref[c] = ((z[c] - _CLIP_MEAN[c]) * (1.0 / _CLIP_STD[c])).astype(o_ref.dtype)


def preprocess(x_cnhw, wwt, wh, nb, num_blocks, single_buffer):
    C, n_pad, H, W = x_cnhw.shape
    R = wh.shape[0]
    return pl.pallas_call(
        _preprocess_kernel,
        out_shape=jax.ShapeDtypeStruct((C, n_pad, R, R), jnp.bfloat16),
        grid=(num_blocks,),
        in_specs=[
            pl.BlockSpec((C, nb, H, W), lambda b: (0, b, 0, 0)),  # image block
            _weight_spec((W, R), single_buffer),                  # col weights (ww^T)
            _weight_spec((R, H), single_buffer),                  # row weights
        ],
        out_specs=pl.BlockSpec((C, nb, R, R), lambda b: (0, b, 0, 0)),
        compiler_params=pltpu.CompilerParams(
            dimension_semantics=("parallel",),
            vmem_limit_bytes=VMEM_LIMIT_BYTES),
    )(x_cnhw, wwt, wh)


# --------------------------------------------------------------------------
# Kernel 2: CLIP-style encode_image (mean-pool + patch embed + proj) fused with
#           the folded PCBM-hybrid head; lane-dense (128-padded) logits.
# --------------------------------------------------------------------------
def _encode_classify_kernel(patch_ref, wp_ref, wproj_ref, whead_ref, b_ref, o_ref):
    # Mean-pool raw patches over P (exact for the linear stand-in encoder);
    # cross-sublane reduce lands on the XLU slot, free when MXU-bound.
    pooled = jnp.mean(patch_ref[...].astype(jnp.float32), axis=1)            # (nb, Dp)
    tokens = jnp.dot(pooled.astype(jnp.bfloat16), wp_ref[...],
                     preferred_element_type=jnp.float32)                     # (nb, width)
    feats = jnp.dot(tokens.astype(jnp.bfloat16), wproj_ref[...],
                    preferred_element_type=jnp.float32)                      # (nb, E) == features.float()
    # Folded head: W_head = cmat @ wc + wres  (single matmul + bias, f32 accumulate).
    o_ref[...] = (jnp.dot(feats.astype(jnp.bfloat16), whead_ref[...],
                          preferred_element_type=jnp.float32) + b_ref[...])


def encode_and_classify(patches, wp, wproj, w_head, bias, nb, num_blocks, single_buffer):
    n_pad, P, Dp = patches.shape
    width = wp.shape[1]
    E = wproj.shape[1]
    ncls_pad = w_head.shape[1]
    return pl.pallas_call(
        _encode_classify_kernel,
        out_shape=jax.ShapeDtypeStruct((n_pad, ncls_pad), jnp.float32),
        grid=(num_blocks,),
        in_specs=[
            pl.BlockSpec((nb, P, Dp), lambda b: (b, 0, 0)),       # patch block
            _weight_spec((Dp, width), single_buffer),             # patch embed
            _weight_spec((width, E), single_buffer),              # projection
            _weight_spec((E, ncls_pad), single_buffer),           # folded head (padded)
            _weight_spec((1, ncls_pad), single_buffer),           # bias (padded, f32)
        ],
        out_specs=pl.BlockSpec((nb, ncls_pad), lambda b: (b, 0)),
        compiler_params=pltpu.CompilerParams(
            dimension_semantics=("parallel",),
            vmem_limit_bytes=VMEM_LIMIT_BYTES),
    )(patches, wp, wproj, w_head, bias)


# --------------------------------------------------------------------------
# ModelWrapper.forward
# --------------------------------------------------------------------------
def model_wrapper_forward(images, params, *, single_buffer_weights=True):
    """images: (N, 3, H, W) float32 in [0, 1]. Returns logits (N, n_classes)."""
    N, C, H, W = images.shape
    wh = params["wh"]
    wwt = params["wwt"]
    R = wh.shape[0]
    p = int(params["patch"])
    g = R // p
    P = g * g
    Dp = C * p * p
    NCLS = params["wc"].shape[1]
    n_cores = _num_tensorcores()

    # ---- preprocess (Resize bicubic + CenterCrop fold into one weight pair + Normalize)
    blocks_pre, nb_pre = _grid_split(
        N, bytes_per_item=C * (H * W + R * R) * 2, n_cores=n_cores, min_block=1)
    n_pre = blocks_pre * nb_pre
    x = images.astype(jnp.bfloat16).transpose(1, 0, 2, 3)        # (C, N, H, W) channel-major
    if n_pre != N:
        x = jnp.pad(x, ((0, 0), (0, n_pre - N), (0, 0), (0, 0)))
    pre = preprocess(x, wwt.astype(jnp.bfloat16), wh.astype(jnp.bfloat16),
                     nb_pre, blocks_pre, single_buffer_weights)   # (C, n_pre, R, R) bf16

    # Patchify (C,N,R,R) -> (N, P, C*p*p) kept in XLA: the interleaving 5-D transpose is
    # not reliably lowerable inside a Mosaic kernel; the bf16 tensor is small vs weights.
    patches = (pre.reshape(C, n_pre, g, p, g, p)
                 .transpose(1, 2, 4, 0, 3, 5)
                 .reshape(n_pre, P, Dp))

    # Host-side prep: fold the PCBM-hybrid head into one matmul, pad to 128 lanes.
    ncls_pad = ((NCLS + LANE - 1) // LANE) * LANE
    w_head = params["cmat"] @ params["wc"] + params["wres"]       # exact fold (linear head)
    w_head = jnp.pad(w_head, ((0, 0), (0, ncls_pad - NCLS))).astype(jnp.bfloat16)
    bias = jnp.pad(params["bias"], ((0, 0), (0, ncls_pad - NCLS)))  # (1, ncls_pad) f32

    blocks_enc, nb_enc = _grid_split(
        n_pre, bytes_per_item=P * Dp * 2 + ncls_pad * 4, n_cores=n_cores, min_block=8)
    n_enc = blocks_enc * nb_enc
    if n_enc != n_pre:
        patches = jnp.pad(patches, ((0, n_enc - n_pre), (0, 0), (0, 0)))

    logits_pad = encode_and_classify(
        patches, params["wp"].astype(jnp.bfloat16), params["wproj"].astype(jnp.bfloat16),
        w_head, bias, nb_enc, blocks_enc, single_buffer_weights)   # (n_enc, 128)
    return logits_pad[:N, :NCLS]


if __name__ == "__main__":
    # Small shapes consistent with the forward pass (CIFAR-like inputs).
    N, C, H, W = 2, 3, 32, 32      # input images (NCHW)
    RES = 16                       # "resolution" (224 in the original)
    PATCH = 4                      # ViT patch size
    P = (RES // PATCH) ** 2        # 16 patches
    DP = C * PATCH * PATCH         # 48
    WIDTH = 32                     # encoder width
    EMBED = 32                     # CLIP embedding dim
    K = 8                          # number of PCBM concepts
    NCLS = 10                      # CIFAR-10 classes

    key = jax.random.PRNGKey(0)
    ks = jax.random.split(key, 7)
    images = jax.random.uniform(ks[0], (N, C, H, W), dtype=jnp.float32)

    wh_np = bicubic_weight_matrix(RES, H)
    ww_np = bicubic_weight_matrix(RES, W)

    params = dict(
        patch=PATCH,
        wh=jnp.asarray(wh_np),                           # (RES, H) row-resize weights
        wwt=jnp.asarray(ww_np.T),                        # (W, RES) col-resize weights (pre-transposed)
        wp=0.05 * jax.random.normal(ks[1], (DP, WIDTH), dtype=jnp.float32),
        wproj=0.05 * jax.random.normal(ks[2], (WIDTH, EMBED), dtype=jnp.float32),
        cmat=0.05 * jax.random.normal(ks[3], (EMBED, K), dtype=jnp.float32),
        wc=0.05 * jax.random.normal(ks[4], (K, NCLS), dtype=jnp.float32),
        wres=0.05 * jax.random.normal(ks[5], (EMBED, NCLS), dtype=jnp.float32),
        bias=0.05 * jax.random.normal(ks[6], (1, NCLS), dtype=jnp.float32),
    )

    try:
        logits = jax.block_until_ready(model_wrapper_forward(images, params))
    except Exception:
        # Fallback for JAX/libtpu builds where single-buffering grid-invariant weights
        # via BlockSpec(pipeline_mode=pl.Buffered(1)) is not supported by pallas_call.
        logits = jax.block_until_ready(
            model_wrapper_forward(images, params, single_buffer_weights=False))
    assert logits.shape == (N, NCLS) and logits.dtype == jnp.float32

    # Pure-JAX f32 reference (unfolded head, per-patch embed then pool) for sanity.
    def ref_forward(x):
        mean = jnp.asarray(_CLIP_MEAN, dtype=jnp.float32)
        std = jnp.asarray(_CLIP_STD, dtype=jnp.float32)
        y = jnp.einsum("rh,nchw->ncrw", params["wh"], x)
        y = jnp.einsum("ncrw,ws->ncrs", y, params["wwt"])
        y = (y - mean[None, :, None, None]) / std[None, :, None, None]
        g = RES // PATCH
        pt = (y.reshape(N, C, g, PATCH, g, PATCH)
                .transpose(0, 2, 4, 1, 3, 5)
                .reshape(N, g * g, DP))
        tok = pt @ params["wp"]
        feats = tok.mean(axis=1) @ params["wproj"]
        return (feats @ params["cmat"]) @ params["wc"] + feats @ params["wres"] + params["bias"]

    # Tolerance accounts for the bf16 operand casts (f32 accumulation everywhere).
    np.testing.assert_allclose(np.asarray(logits), np.asarray(ref_forward(images)),
                               rtol=2e-2, atol=2e-3)
    print("KERNEL_OK")
</pallas_src>

<mosaic_0001>
module attributes {stable_mosaic.version = 11 : i64} {
  func.func @_preprocess_kernel(%arg0: i32, %arg1: memref<3x2x32x32xbf16, #tpu.memory_space<vmem>>, %arg2: memref<32x16xbf16, #tpu.memory_space<vmem>>, %arg3: memref<16x32xbf16, #tpu.memory_space<vmem>>, %arg4: memref<3x2x16x16xbf16, #tpu.memory_space<vmem>>) attributes {dimension_semantics = [#tpu.dimension_semantics<parallel>], iteration_bounds = array<i64: 1>, scalar_prefetch = 0 : i64, scratch_operands = 0 : i64, tpu.core_type = #tpu.core_type<tc>, window_params = [{transform_indices = @transform_0, window_bounds = array<i64: 3, 2, 32, 32>}, {pipeline_mode = #tpu.pipeline_mode<synchronous>, transform_indices = @transform_1, window_bounds = array<i64: 32, 16>}, {pipeline_mode = #tpu.pipeline_mode<synchronous>, transform_indices = @transform_2, window_bounds = array<i64: 16, 32>}, {transform_indices = @transform_3, window_bounds = array<i64: 3, 2, 16, 16>}]} {
    %c0 = arith.constant 0 : index
    %c0_0 = arith.constant 0 : index
    %c0_1 = arith.constant 0 : index
    %c0_2 = arith.constant 0 : index
    %0 = vector.load %arg1[%c0, %c0_0, %c0_1, %c0_2] : memref<3x2x32x32xbf16, #tpu.memory_space<vmem>>, vector<3x2x32x32xbf16>
    %1 = vector.shape_cast %0 : vector<3x2x32x32xbf16> to vector<192x32xbf16>
    %c0_3 = arith.constant 0 : index
    %c0_4 = arith.constant 0 : index
    %2 = vector.load %arg2[%c0_3, %c0_4] : memref<32x16xbf16, #tpu.memory_space<vmem>>, vector<32x16xbf16>
    %cst = arith.constant dense<0.000000e+00> : vector<192x16xf32>
    %3 = tpu.matmul %1, %2, %cst {dimension_numbers = #tpu.dot_dimension_numbers<[1], [0], [0], [1], [0, 0, 1, 1], [], []>} : vector<192x32xbf16>, vector<32x16xbf16>, vector<192x16xf32> -> vector<192x16xf32>
    %4 = arith.truncf %3 : vector<192x16xf32> to vector<192x16xbf16>
    %5 = vector.shape_cast %4 : vector<192x16xbf16> to vector<6x32x16xbf16>
    %c0_5 = arith.constant 0 : index
    %c0_6 = arith.constant 0 : index
    %6 = vector.load %arg3[%c0_5, %c0_6] : memref<16x32xbf16, #tpu.memory_space<vmem>>, vector<16x32xbf16>
    %7 = vector.shape_cast %6 : vector<16x32xbf16> to vector<1x16x32xbf16>
    %8 = vector.broadcast %7 : vector<1x16x32xbf16> to vector<6x16x32xbf16>
    "tpu.trace_start"() <{level = 10 : i32, message = "bri,bis->brs"}> : () -> ()
    %cst_7 = arith.constant dense<0.000000e+00> : vector<6x16x16xf32>
    %9 = tpu.matmul %8, %5, %cst_7 {dimension_numbers = #tpu.dot_dimension_numbers<[2], [1], [1], [2], [0, 0, 0, 1, 1, 2], [0], [0]>} : vector<6x16x32xbf16>, vector<6x32x16xbf16>, vector<6x16x16xf32> -> vector<6x16x16xf32>
    "tpu.trace_stop"() : () -> ()
    %10 = vector.shape_cast %9 : vector<6x16x16xf32> to vector<3x2x16x16xf32>
    %11 = vector.extract_strided_slice %10 {offsets = [0, 0, 0, 0], sizes = [1, 2, 16, 16], strides = [1, 1, 1, 1]} : vector<3x2x16x16xf32> to vector<1x2x16x16xf32>
    %12 = vector.shape_cast %11 : vector<1x2x16x16xf32> to vector<2x16x16xf32>
    %cst_8 = arith.constant 0.48145467 : f32
    %13 = vector.broadcast %cst_8 : f32 to vector<2x16x16xf32>
    %14 = arith.subf %12, %13 : vector<2x16x16xf32>
    %cst_9 = arith.constant 3.72259879 : f32
    %15 = vector.broadcast %cst_9 : f32 to vector<2x16x16xf32>
    %16 = arith.mulf %14, %15 : vector<2x16x16xf32>
    %17 = arith.truncf %16 : vector<2x16x16xf32> to vector<2x16x16xbf16>
    %c0_10 = arith.constant 0 : index
    %c0_11 = arith.constant 0 : index
    %c0_12 = arith.constant 0 : index
    %c0_13 = arith.constant 0 : index
    %18 = vector.load %arg4[%c0_10, %c0_11, %c0_12, %c0_13] : memref<3x2x16x16xbf16, #tpu.memory_space<vmem>>, vector<1x2x16x16xbf16>
    %19 = vector.shape_cast %18 : vector<1x2x16x16xbf16> to vector<2x16x16xbf16>
    %20 = vector.shape_cast %17 : vector<2x16x16xbf16> to vector<1x2x16x16xbf16>
    tpu.vector_store %arg4[%c0_10, %c0_11, %c0_12, %c0_13], %20 {strides = array<i32>} : memref<3x2x16x16xbf16, #tpu.memory_space<vmem>>, vector<1x2x16x16xbf16>,
    %21 = vector.extract_strided_slice %10 {offsets = [1, 0, 0, 0], sizes = [1, 2, 16, 16], strides = [1, 1, 1, 1]} : vector<3x2x16x16xf32> to vector<1x2x16x16xf32>
    %22 = vector.shape_cast %21 : vector<1x2x16x16xf32> to vector<2x16x16xf32>
    %cst_14 = arith.constant 0.457827508 : f32
    %23 = vector.broadcast %cst_14 : f32 to vector<2x16x16xf32>
    %24 = arith.subf %22, %23 : vector<2x16x16xf32>
    %cst_15 = arith.constant 3.82698107 : f32
    %25 = vector.broadcast %cst_15 : f32 to vector<2x16x16xf32>
    %26 = arith.mulf %24, %25 : vector<2x16x16xf32>
    %27 = arith.truncf %26 : vector<2x16x16xf32> to vector<2x16x16xbf16>
    %c1 = arith.constant 1 : index
    %c0_16 = arith.constant 0 : index
    %c0_17 = arith.constant 0 : index
    %c0_18 = arith.constant 0 : index
    %28 = vector.load %arg4[%c1, %c0_16, %c0_17, %c0_18] : memref<3x2x16x16xbf16, #tpu.memory_space<vmem>>, vector<1x2x16x16xbf16>
    %29 = vector.shape_cast %28 : vector<1x2x16x16xbf16> to vector<2x16x16xbf16>
    %30 = vector.shape_cast %27 : vector<2x16x16xbf16> to vector<1x2x16x16xbf16>
    tpu.vector_store %arg4[%c1, %c0_16, %c0_17, %c0_18], %30 {strides = array<i32>} : memref<3x2x16x16xbf16, #tpu.memory_space<vmem>>, vector<1x2x16x16xbf16>,
    %31 = vector.extract_strided_slice %10 {offsets = [2, 0, 0, 0], sizes = [1, 2, 16, 16], strides = [1, 1, 1, 1]} : vector<3x2x16x16xf32> to vector<1x2x16x16xf32>
    %32 = vector.shape_cast %31 : vector<1x2x16x16xf32> to vector<2x16x16xf32>
    %cst_19 = arith.constant 0.408210725 : f32
    %33 = vector.broadcast %cst_19 : f32 to vector<2x16x16xf32>
    %34 = arith.subf %32, %33 : vector<2x16x16xf32>
    %cst_20 = arith.constant 3.62611675 : f32
    %35 = vector.broadcast %cst_20 : f32 to vector<2x16x16xf32>
    %36 = arith.mulf %34, %35 : vector<2x16x16xf32>
    %37 = arith.truncf %36 : vector<2x16x16xf32> to vector<2x16x16xbf16>
    %c2 = arith.constant 2 : index
    %c0_21 = arith.constant 0 : index
    %c0_22 = arith.constant 0 : index
    %c0_23 = arith.constant 0 : index
    %38 = vector.load %arg4[%c2, %c0_21, %c0_22, %c0_23] : memref<3x2x16x16xbf16, #tpu.memory_space<vmem>>, vector<1x2x16x16xbf16>
    %39 = vector.shape_cast %38 : vector<1x2x16x16xbf16> to vector<2x16x16xbf16>
    %40 = vector.shape_cast %37 : vector<2x16x16xbf16> to vector<1x2x16x16xbf16>
    tpu.vector_store %arg4[%c2, %c0_21, %c0_22, %c0_23], %40 {strides = array<i32>} : memref<3x2x16x16xbf16, #tpu.memory_space<vmem>>, vector<1x2x16x16xbf16>,
    return
  }
  func.func @transform_0(%arg0: i32) -> (i32, i32, i32, i32) {
    %c0_i32 = arith.constant 0 : i32
    %c0_i32_0 = arith.constant 0 : i32
    %c0_i32_1 = arith.constant 0 : i32
    %c0_i32_2 = arith.constant 0 : i32
    return %c0_i32, %arg0, %c0_i32_0, %c0_i32_1 : i32, i32, i32, i32
  }
  func.func @transform_1(%arg0: i32) -> (i32, i32) {
    %c0_i32 = arith.constant 0 : i32
    %c0_i32_0 = arith.constant 0 : i32
    %c0_i32_1 = arith.constant 0 : i32
    return %c0_i32, %c0_i32_0 : i32, i32
  }
  func.func @transform_2(%arg0: i32) -> (i32, i32) {
    %c0_i32 = arith.constant 0 : i32
    %c0_i32_0 = arith.constant 0 : i32
    %c0_i32_1 = arith.constant 0 : i32
    return %c0_i32, %c0_i32_0 : i32, i32
  }
  func.func @transform_3(%arg0: i32) -> (i32, i32, i32, i32) {
    %c0_i32 = arith.constant 0 : i32
    %c0_i32_0 = arith.constant 0 : i32
    %c0_i32_1 = arith.constant 0 : i32
    %c0_i32_2 = arith.constant 0 : i32
    return %c0_i32, %arg0, %c0_i32_0, %c0_i32_1 : i32, i32, i32, i32
  }
}

module attributes {stable_mosaic.version = 11 : i64} {
  func.func @_preprocess_kernel(%arg0: i32, %arg1: memref<3x2x32x32xbf16, #tpu.memory_space<vmem>>, %arg2: memref<32x16xbf16, #tpu.memory_space<vmem>>, %arg3: memref<16x32xbf16, #tpu.memory_space<vmem>>, %arg4: memref<3x2x16x16xbf16, #tpu.memory_space<vmem>>) attributes {dimension_semantics = [#tpu.dimension_semantics<parallel>], iteration_bounds = array<i64: 1>, scalar_prefetch = 0 : i64, scratch_operands = 0 : i64, tpu.core_type = #tpu.core_type<tc>, window_params = [{transform_indices = @transform_0, window_bounds = array<i64: 3, 2, 32, 32>}, {pipeline_mode = #tpu.pipeline_mode<synchronous>, transform_indices = @transform_1, window_bounds = array<i64: 32, 16>}, {pipeline_mode = #tpu.pipeline_mode<synchronous>, transform_indices = @transform_2, window_bounds = array<i64: 16, 32>}, {transform_indices = @transform_3, window_bounds = array<i64: 3, 2, 16, 16>}]} {
    %c0 = arith.constant 0 : index
    %c0_0 = arith.constant 0 : index
    %c0_1 = arith.constant 0 : index
    %c0_2 = arith.constant 0 : index
    %0 = vector.load %arg1[%c0, %c0_0, %c0_1, %c0_2] : memref<3x2x32x32xbf16, #tpu.memory_space<vmem>>, vector<3x2x32x32xbf16>
    %1 = vector.shape_cast %0 : vector<3x2x32x32xbf16> to vector<192x32xbf16>
    %c0_3 = arith.constant 0 : index
    %c0_4 = arith.constant 0 : index
    %2 = vector.load %arg2[%c0_3, %c0_4] : memref<32x16xbf16, #tpu.memory_space<vmem>>, vector<32x16xbf16>
    %cst = arith.constant dense<0.000000e+00> : vector<192x16xf32>
    %3 = tpu.matmul %1, %2, %cst {dimension_numbers = #tpu.dot_dimension_numbers<[1], [0], [0], [1], [0, 0, 1, 1], [], []>} : vector<192x32xbf16>, vector<32x16xbf16>, vector<192x16xf32> -> vector<192x16xf32>
    %4 = arith.truncf %3 : vector<192x16xf32> to vector<192x16xbf16>
    %5 = vector.shape_cast %4 : vector<192x16xbf16> to vector<6x32x16xbf16>
    %c0_5 = arith.constant 0 : index
    %c0_6 = arith.constant 0 : index
    %6 = vector.load %arg3[%c0_5, %c0_6] : memref<16x32xbf16, #tpu.memory_space<vmem>>, vector<16x32xbf16>
    %7 = vector.shape_cast %6 : vector<16x32xbf16> to vector<1x16x32xbf16>
    %8 = vector.broadcast %7 : vector<1x16x32xbf16> to vector<6x16x32xbf16>
    "tpu.trace_start"() <{level = 10 : i32, message = "bri,bis->brs"}> : () -> ()
    %cst_7 = arith.constant dense<0.000000e+00> : vector<6x16x16xf32>
    %9 = tpu.matmul %8, %5, %cst_7 {dimension_numbers = #tpu.dot_dimension_numbers<[2], [1], [1], [2], [0, 0, 0, 1, 1, 2], [0], [0]>} : vector<6x16x32xbf16>, vector<6x32x16xbf16>, vector<6x16x16xf32> -> vector<6x16x16xf32>
    "tpu.trace_stop"() : () -> ()
    %10 = vector.shape_cast %9 : vector<6x16x16xf32> to vector<3x2x16x16xf32>
    %11 = vector.extract_strided_slice %10 {offsets = [0, 0, 0, 0], sizes = [1, 2, 16, 16], strides = [1, 1, 1, 1]} : vector<3x2x16x16xf32> to vector<1x2x16x16xf32>
    %12 = vector.shape_cast %11 : vector<1x2x16x16xf32> to vector<2x16x16xf32>
    %cst_8 = arith.constant 0.48145467 : f32
    %13 = vector.broadcast %cst_8 : f32 to vector<2x16x16xf32>
    %14 = arith.subf %12, %13 : vector<2x16x16xf32>
    %cst_9 = arith.constant 3.72259879 : f32
    %15 = vector.broadcast %cst_9 : f32 to vector<2x16x16xf32>
    %16 = arith.mulf %14, %15 : vector<2x16x16xf32>
    %17 = arith.truncf %16 : vector<2x16x16xf32> to vector<2x16x16xbf16>
    %c0_10 = arith.constant 0 : index
    %c0_11 = arith.constant 0 : index
    %c0_12 = arith.constant 0 : index
    %c0_13 = arith.constant 0 : index
    %18 = vector.load %arg4[%c0_10, %c0_11, %c0_12, %c0_13] : memref<3x2x16x16xbf16, #tpu.memory_space<vmem>>, vector<1x2x16x16xbf16>
    %19 = vector.shape_cast %18 : vector<1x2x16x16xbf16> to vector<2x16x16xbf16>
    %20 = vector.shape_cast %17 : vector<2x16x16xbf16> to vector<1x2x16x16xbf16>
    tpu.vector_store %arg4[%c0_10, %c0_11, %c0_12, %c0_13], %20 {strides = array<i32>} : memref<3x2x16x16xbf16, #tpu.memory_space<vmem>>, vector<1x2x16x16xbf16>,
    %21 = vector.extract_strided_slice %10 {offsets = [1, 0, 0, 0], sizes = [1, 2, 16, 16], strides = [1, 1, 1, 1]} : vector<3x2x16x16xf32> to vector<1x2x16x16xf32>
    %22 = vector.shape_cast %21 : vector<1x2x16x16xf32> to vector<2x16x16xf32>
    %cst_14 = arith.constant 0.457827508 : f32
    %23 = vector.broadcast %cst_14 : f32 to vector<2x16x16xf32>
    %24 = arith.subf %22, %23 : vector<2x16x16xf32>
    %cst_15 = arith.constant 3.82698107 : f32
    %25 = vector.broadcast %cst_15 : f32 to vector<2x16x16xf32>
    %26 = arith.mulf %24, %25 : vector<2x16x16xf32>
    %27 = arith.truncf %26 : vector<2x16x16xf32> to vector<2x16x16xbf16>
    %c1 = arith.constant 1 : index
    %c0_16 = arith.constant 0 : index
    %c0_17 = arith.constant 0 : index
    %c0_18 = arith.constant 0 : index
    %28 = vector.load %arg4[%c1, %c0_16, %c0_17, %c0_18] : memref<3x2x16x16xbf16, #tpu.memory_space<vmem>>, vector<1x2x16x16xbf16>
    %29 = vector.shape_cast %28 : vector<1x2x16x16xbf16> to vector<2x16x16xbf16>
    %30 = vector.shape_cast %27 : vector<2x16x16xbf16> to vector<1x2x16x16xbf16>
    tpu.vector_store %arg4[%c1, %c0_16, %c0_17, %c0_18], %30 {strides = array<i32>} : memref<3x2x16x16xbf16, #tpu.memory_space<vmem>>, vector<1x2x16x16xbf16>,
    %31 = vector.extract_strided_slice %10 {offsets = [2, 0, 0, 0], sizes = [1, 2, 16, 16], strides = [1, 1, 1, 1]} : vector<3x2x16x16xf32> to vector<1x2x16x16xf32>
    %32 = vector.shape_cast %31 : vector<1x2x16x16xf32> to vector<2x16x16xf32>
    %cst_19 = arith.constant 0.408210725 : f32
    %33 = vector.broadcast %cst_19 : f32 to vector<2x16x16xf32>
    %34 = arith.subf %32, %33 : vector<2x16x16xf32>
    %cst_20 = arith.constant 3.62611675 : f32
    %35 = vector.broadcast %cst_20 : f32 to vector<2x16x16xf32>
    %36 = arith.mulf %34, %35 : vector<2x16x16xf32>
    %37 = arith.truncf %36 : vector<2x16x16xf32> to vector<2x16x16xbf16>
    %c2 = arith.constant 2 : index
    %c0_21 = arith.constant 0 : index
    %c0_22 = arith.constant 0 : index
    %c0_23 = arith.constant 0 : index
    %38 = vector.load %arg4[%c2, %c0_21, %c0_22, %c0_23] : memref<3x2x16x16xbf16, #tpu.memory_space<vmem>>, vector<1x2x16x16xbf16>
    %39 = vector.shape_cast %38 : vector<1x2x16x16xbf16> to vector<2x16x16xbf16>
    %40 = vector.shape_cast %37 : vector<2x16x16xbf16> to vector<1x2x16x16xbf16>
    tpu.vector_store %arg4[%c2, %c0_21, %c0_22, %c0_23], %40 {strides = array<i32>} : memref<3x2x16x16xbf16, #tpu.memory_space<vmem>>, vector<1x2x16x16xbf16>,
    return
  }
  func.func @transform_0(%arg0: i32) -> (i32, i32, i32, i32) {
    %c0_i32 = arith.constant 0 : i32
    %c0_i32_0 = arith.constant 0 : i32
    %c0_i32_1 = arith.constant 0 : i32
    %c0_i32_2 = arith.constant 0 : i32
    return %c0_i32, %arg0, %c0_i32_0, %c0_i32_1 : i32, i32, i32, i32
  }
  func.func @transform_1(%arg0: i32) -> (i32, i32) {
    %c0_i32 = arith.constant 0 : i32
    %c0_i32_0 = arith.constant 0 : i32
    %c0_i32_1 = arith.constant 0 : i32
    return %c0_i32, %c0_i32_0 : i32, i32
  }
  func.func @transform_2(%arg0: i32) -> (i32, i32) {
    %c0_i32 = arith.constant 0 : i32
    %c0_i32_0 = arith.constant 0 : i32
    %c0_i32_1 = arith.constant 0 : i32
    return %c0_i32, %c0_i32_0 : i32, i32
  }
  func.func @transform_3(%arg0: i32) -> (i32, i32, i32, i32) {
    %c0_i32 = arith.constant 0 : i32
    %c0_i32_0 = arith.constant 0 : i32
    %c0_i32_1 = arith.constant 0 : i32
    %c0_i32_2 = arith.constant 0 : i32
    return %c0_i32, %arg0, %c0_i32_0, %c0_i32_1 : i32, i32, i32, i32
  }
}

</mosaic_0001>

<bundles_post_ra>
// kernel: tpu_custom_call.1
= control target key start
LH: loop header
LB: loop body
LE: loop exit
PB: predicated region body
PF: predicated region fallthrough
CT: control target
= control target key end

     0   :  { %8 = vsyncpa [#allocation3], 0  ;;  %s1033_s0 = inlined_call_operand.hbm [shape: bf16[3,2,32,32], index: 0, kind: input, shape index: {}]   ;;  %s1034_s1 = inlined_call_operand.vmem [shape: bf16[32,16], index: 1, kind: input, shape index: {}]   ;;  %s1035_s2 = inlined_call_operand.vmem [shape: bf16[16,32], index: 2, kind: input, shape index: {}]   ;;  %s1036_s3 = inlined_call_operand.hbm [shape: bf16[3,2,16,16], index: 3, kind: output, shape index: {}]  }
   0x1   :  { %9 = vsyncpa [#allocation4], 0  ;;  %s914_s12 = smov [#allocation2]   ;;  %s866_s16 = scalar_lea.hbm %s1033_s0, 1536 }
   0x2   :  { %s15_s13 = sshll.u32 %s914_s12, 4  ;;  %p867_p0 = scmp.ne.s32.totalorder %s1033_s0, %s866_s16  ;;  %s16_s13 = int_to_ptr.vmem [resolvable:$true] %s15_s13 }
   0x3   :  { %p870_p1 = scmp.lt.u32.totalorder %s866_s16, %s1033_s0 }
   0x5   :  { %p872_p2 = pnand %p870_p1, %p867_p0 }
   0x7   :  { %875 = shalt.err (!%p872_p2)
}
   0x8   :  { %s876_s21 = scalar_lea.vmem %s16_s13, 1536  ;;  %p881_p4 = scmp.lt.s32.totalorder %s16_s13, %s16_s13 }
   0x9   :  { %p877_p3 = scmp.ne.s32.totalorder %s16_s13, %s876_s21  ;;  %p882_p5 = scmp.lt.s32.totalorder %s876_s21, %s876_s21 }
   0xb   :  { %p883_p6 = por %p882_p5, %p881_p4 }
   0xd   :  { %p884_p7 = pnand %p883_p6, %p877_p3 }
   0xf   :  { %887 = shalt.err (!%p884_p7)
}
  0x10   :  { %s915_s22 = smov 64   ;;  %s916_s23 = smov 4  }
  0x11   :  { %21 = dma.hbm_to_vmem [thread:$0]  %s1033_s0, 1536, %s16_s13, [#allocation3], %s915_s22, %s915_s22, %s916_s23  }
  0x12   :  { %910 = dma.done.wait [#allocation3], 1536  }
  0x13   :  { %911 = vsyncadd [#allocation3], 4294965760  ;;  %v851_v0 = vld [vmem:[%s1034_s1] sm:$0xff]   ;;  %v852_v1 = vld [vmem:[%s1034_s1 + $0x8] sm:$0xff]   ;;  %vm130_vm0 = vcmask 261120   ;;  %v917_v14 = vmov 0.0  }
  0x14   :  { %769 = vmatprep.subr.bf16.mxu0 %v851_v0  ;;  %v853_v2 = vld [vmem:[#allocation2] sm:$0xff]   ;;  %v854_v3 = vld [vmem:[#allocation2 + $0x8] sm:$0xff]   ;;  %v855_v4 = vld [vmem:[#allocation2 + $0x10] sm:$0xff]   ;;  %797 = vmatprep.subr.bf16.mxu1 %v917_v14  ;;  %vm918_vm1 = vmmov 0   ;;  %vm588_vm2 = vcmask 125952  }
  0x15   :  { %770 = vmatpush3.bf16.msra.mxu0 %v851_v0  ;;  %773 = vmatprep.mubr.msk.bf16.mxu0 %vm130_vm0, %v853_v2  ;;  %v856_v5 = vld [vmem:[#allocation2 + $0x18] sm:$0xff]   ;;  %v857_v6 = vld [vmem:[#allocation2 + $0x20] sm:$0xff]   ;;  %v858_v7 = vld [vmem:[#allocation2 + $0x28] sm:$0xff]  }
  0x16   :  { %771 = vmatprep.subr.bf16.mxu0 %v852_v1  ;;  %v859_v8 = vld [vmem:[#allocation2 + $0x30] sm:$0xff]   ;;  %v860_v9 = vld [vmem:[#allocation2 + $0x38] sm:$0xff]   ;;  %v861_v10 = vld [vmem:[#allocation2 + $0x40] sm:$0xff]   ;;  %801 = vmatprep.mubr.msk.bf16.mxu1 %vm918_vm1, %v917_v14 }
  0x17   :  { %v862_v11 = vld [vmem:[#allocation2 + $0x48] sm:$0xff]   ;;  %v863_v12 = vld [vmem:[#allocation2 + $0x50] sm:$0xff]   ;;  %v864_v13 = vld [vmem:[#allocation2 + $0x58] sm:$0xff]  }
  0x18   :  { %v865_v23 = vld [vmem:[%s1035_s2] sm:$0xff]   ;;  %s919_s2 = smov [#allocation5]  }
  0x19   :  { %772 = vmatpush3.bf16.msra.mxu0 %v852_v1  ;;  %s656_s30 = sshll.u32 %s919_s2, 4  ;;  %s657_s30 = int_to_ptr.vmem [resolvable:$true] %s656_s30 }
  0x1a   :  { %s888_s4 = scalar_lea.vmem %s657_s30, 768  ;;  %p893_p9 = scmp.lt.s32.totalorder %s657_s30, %s657_s30 }
  0x1b   :  { %p889_p8 = scmp.ne.s32.totalorder %s657_s30, %s888_s4  ;;  %p894_p10 = scmp.lt.s32.totalorder %s888_s4, %s888_s4 }
  0x1c   :  { %774 = vmatmul.mubr.msk.bf16.vlgmr.msra.gmra.mrb[0].mxu0 %vm130_vm0, %v854_v3 }
  0x1d   :  { %777 = vmatprep.mubr.msk.bf16.mxu0 %vm130_vm0, %v855_v4  ;;  %p895_p11 = por %p894_p10, %p893_p9 }
  0x1f   :  { %p896_p12 = pnand %p895_p11, %p889_p8 }
  0x24   :  { %778 = vmatmul.mubr.msk.bf16.gmra.mrb[4].mxu0 %vm130_vm0, %v856_v5 }
  0x25   :  { %781 = vmatprep.mubr.msk.bf16.mxu0 %vm130_vm0, %v857_v6 }
  0x2c   :  { %782 = vmatmul.mubr.msk.bf16.gmra.mrb[8].mxu0 %vm130_vm0, %v858_v7 }
  0x2d   :  { %785 = vmatprep.mubr.msk.bf16.mxu0 %vm130_vm0, %v859_v8 }
  0x34   :  { %786 = vmatmul.mubr.msk.bf16.gmra.mrb[12].mxu0 %vm130_vm0, %v860_v9 }
  0x35   :  { %789 = vmatprep.mubr.msk.bf16.mxu0 %vm130_vm0, %v861_v10 }
  0x3c   :  { %790 = vmatmul.mubr.msk.bf16.gmra.mrb[16].mxu0 %vm130_vm0, %v862_v11 }
  0x3d   :  { %793 = vmatprep.mubr.msk.bf16.mxu0 %vm130_vm0, %v863_v12 }
  0x44   :  { %794 = vmatmul.mubr.msk.bf16.gmra.mrb[20].mxu0 %vm130_vm0, %v864_v13 }
  0xef   :  { %v775_v15 = vpop.f32.mrb[0].mxu0 }
  0xf0   :  { %v201_v16 = vpop.f32.mrb[1].mxu0 }
  0xf1   :  { %v776_v17 = vpop.f32.mrb[2].mxu0 }
  0xf2   :  { %v297_v18 = vpack.c.bf16 %v776_v17, %v775_v15  ;;  %v204_v19 = vpop.f32.mrb[3].mxu0 }
  0xf3   :  { %v296_v20 = vpack.c.bf16 %v204_v19, %v201_v16 }
  0xf5   :  { %798 = vmatpush3.bf16.msra.mxu1 %v296_v20 }
  0xf6   :  { %799 = vmatprep.subr.bf16.mxu1 %v917_v14 }
  0xf7   :  { %v779_v21 = vpop.f32.mrb[4].mxu0 }
  0xf8   :  { %v217_v22 = vpop.f32.mrb[5].mxu0 }
  0xf9   :  { %v780_v24 = vpop.f32.mrb[6].mxu0  ;;  %800 = vmatpush3.bf16.msra.mxu1 %v297_v18 }
  0xfa   :  { %v299_v25 = vpack.c.bf16 %v780_v24, %v779_v21  ;;  %v220_v26 = vpop.f32.mrb[7].mxu0  ;;  %805 = vmatprep.subr.bf16.mxu1 %v917_v14 }
  0xfb   :  { %v298_v27 = vpack.c.bf16 %v220_v26, %v217_v22 }
  0xfc   :  { %802 = vmatmul.mubr.msk.bf16.vlgmr.msra.gmra.mrb[0].mxu1 %vm130_vm0, %v865_v23 }
  0xfd   :  { %806 = vmatpush3.bf16.msra.mxu1 %v298_v27  ;;  %809 = vmatprep.mubr.msk.bf16.mxu1 %vm918_vm1, %v917_v14 }
  0xfe   :  { %807 = vmatprep.subr.bf16.mxu1 %v917_v14 }
  0xff   :  { %v783_v28 = vpop.f32.mrb[8].mxu0 }
 0x100   :  { %v233_v29 = vpop.f32.mrb[9].mxu0 }
 0x101   :  { %v784_v30 = vpop.f32.mrb[10].mxu0  ;;  %808 = vmatpush3.bf16.msra.mxu1 %v299_v25 }
 0x102   :  { %v301_v31 = vpack.c.bf16 %v784_v30, %v783_v28  ;;  %v236_v32 = vpop.f32.mrb[11].mxu0  ;;  %813 = vmatprep.subr.bf16.mxu1 %v917_v14 }
 0x103   :  { %v300_v33 = vpack.c.bf16 %v236_v32, %v233_v29 }
 0x104   :  { %810 = vmatmul.mubr.msk.bf16.vlgmr.msra.gmra.mrb[4].mxu1 %vm130_vm0, %v865_v23 }
 0x105   :  { %814 = vmatpush3.bf16.msra.mxu1 %v300_v33  ;;  %817 = vmatprep.mubr.msk.bf16.mxu1 %vm918_vm1, %v917_v14 }
 0x106   :  { %815 = vmatprep.subr.bf16.mxu1 %v917_v14 }
 0x107   :  { %v787_v34 = vpop.f32.mrb[12].mxu0 }
 0x108   :  { %v249_v35 = vpop.f32.mrb[13].mxu0 }
 0x109   :  { %v788_v36 = vpop.f32.mrb[14].mxu0  ;;  %816 = vmatpush3.bf16.msra.mxu1 %v301_v31 }
 0x10a   :  { %v303_v37 = vpack.c.bf16 %v788_v36, %v787_v34  ;;  %v252_v38 = vpop.f32.mrb[15].mxu0  ;;  %821 = vmatprep.subr.bf16.mxu1 %v917_v14 }
 0x10b   :  { %v302_v39 = vpack.c.bf16 %v252_v38, %v249_v35 }
 0x10c   :  { %818 = vmatmul.mubr.msk.bf16.vlgmr.msra.gmra.mrb[8].mxu1 %vm130_vm0, %v865_v23 }
 0x10d   :  { %822 = vmatpush3.bf16.msra.mxu1 %v302_v39  ;;  %825 = vmatprep.mubr.msk.bf16.mxu1 %vm918_vm1, %v917_v14 }
 0x10e   :  { %823 = vmatprep.subr.bf16.mxu1 %v917_v14 }
 0x10f   :  { %v791_v40 = vpop.f32.mrb[16].mxu0 }
 0x110   :  { %v265_v41 = vpop.f32.mrb[17].mxu0 }
 0x111   :  { %v792_v42 = vpop.f32.mrb[18].mxu0  ;;  %824 = vmatpush3.bf16.msra.mxu1 %v303_v37 }
 0x112   :  { %v305_v43 = vpack.c.bf16 %v792_v42, %v791_v40  ;;  %v268_v44 = vpop.f32.mrb[19].mxu0  ;;  %829 = vmatprep.subr.bf16.mxu1 %v917_v14 }
 0x113   :  { %v304_v45 = vpack.c.bf16 %v268_v44, %v265_v41 }
 0x114   :  { %826 = vmatmul.mubr.msk.bf16.vlgmr.msra.gmra.mrb[12].mxu1 %vm130_vm0, %v865_v23 }
 0x115   :  { %830 = vmatpush3.bf16.msra.mxu1 %v304_v45  ;;  %833 = vmatprep.mubr.msk.bf16.mxu1 %vm918_vm1, %v917_v14 }
 0x116   :  { %831 = vmatprep.subr.bf16.mxu1 %v917_v14 }
 0x117   :  { %v795_v46 = vpop.f32.mrb[20].mxu0 }
 0x118   :  { %v281_v47 = vpop.f32.mrb[21].mxu0 }
 0x119   :  { %v796_v48 = vpop.f32.mrb[22].mxu0  ;;  %832 = vmatpush3.bf16.msra.mxu1 %v305_v43 }
 0x11a   :  { %v307_v49 = vpack.c.bf16 %v796_v48, %v795_v46  ;;  %v284_v50 = vpop.f32.mrb[23].mxu0  ;;  %837 = vmatprep.subr.bf16.mxu1 %v917_v14 }
 0x11b   :  { %v306_v51 = vpack.c.bf16 %v284_v50, %v281_v47 }
 0x11c   :  { %834 = vmatmul.mubr.msk.bf16.vlgmr.msra.gmra.mrb[16].mxu1 %vm130_vm0, %v865_v23 }
 0x11d   :  { %838 = vmatpush3.bf16.msra.mxu1 %v306_v51  ;;  %841 = vmatprep.mubr.msk.bf16.mxu1 %vm918_vm1, %v917_v14 }
 0x11e   :  { %839 = vmatprep.subr.bf16.mxu1 %v917_v14 }
 0x121   :  { %840 = vmatpush3.bf16.msra.mxu1 %v307_v49 }
 0x124   :  { %842 = vmatmul.mubr.msk.bf16.vlgmr.msra.gmra.mrb[20].mxu1 %vm130_vm0, %v865_v23 }
 0x1cf   :  { %v352_v52 = vpop.f32.mrb[0].mxu1 }
 0x1d0   :  { %v701_v53 = vadd.f32 -0.48145467, %v352_v52  ;;  %v803_v54 = vpop.f32.mrb[1].mxu1 }
 0x1d1   :  { %v355_v55 = vpop.f32.mrb[2].mxu1 }
 0x1d2   :  { %v568_v56 = vmul.f32 3.7225988, %v701_v53  ;;  %v702_v57 = vadd.f32 -0.48145467, %v355_v55  ;;  %v804_v58 = vpop.f32.mrb[3].mxu1 }
 0x1d4   :  { %v725_v59 = vpack.c.bf16 %v568_v56, %v568_v56  ;;  %v569_v60 = vmul.f32 3.7225988, %v702_v57 }
 0x1d6   :  { %589 = vst.msk [vmem:[#allocation5] sm:$0xf] %vm588_vm2, %v725_v59  ;;  %v726_v61 = vpack.c.bf16 %v569_v60, %v569_v60 }
 0x1d7   :  { %v393_v62 = vpop.f32.mrb[4].mxu1 }
 0x1d8   :  { %590 = vst.msk [vmem:[#allocation5 + $0x4] sm:$0xf] %vm588_vm2, %v726_v61  ;;  %v703_v63 = vadd.f32 -0.48145467, %v393_v62  ;;  %v811_v0 = vpop.f32.mrb[5].mxu1 }
 0x1d9   :  { %v396_v1 = vpop.f32.mrb[6].mxu1 }
 0x1da   :  { %v570_v2 = vmul.f32 3.7225988, %v703_v63  ;;  %v704_v3 = vadd.f32 -0.48145467, %v396_v1  ;;  %v812_v4 = vpop.f32.mrb[7].mxu1 }
 0x1dc   :  { %v727_v5 = vpack.c.bf16 %v570_v2, %v570_v2  ;;  %v571_v6 = vmul.f32 3.7225988, %v704_v3 }
 0x1de   :  { %591 = vst.msk [vmem:[#allocation5 + $0x8] sm:$0xf] %vm588_vm2, %v727_v5  ;;  %v728_v7 = vpack.c.bf16 %v571_v6, %v571_v6 }
 0x1df   :  { %v434_v8 = vpop.f32.mrb[8].mxu1 }
 0x1e0   :  { %592 = vst.msk [vmem:[#allocation5 + $0xc] sm:$0xf] %vm588_vm2, %v728_v7  ;;  %v709_v9 = vadd.f32 -0.4578275, %v434_v8  ;;  %v819_v10 = vpop.f32.mrb[9].mxu1 }
 0x1e1   :  { %v437_v11 = vpop.f32.mrb[10].mxu1 }
 0x1e2   :  { %v597_v12 = vmul.f32 3.826981, %v709_v9  ;;  %v710_v13 = vadd.f32 -0.4578275, %v437_v11  ;;  %v820_v14 = vpop.f32.mrb[11].mxu1 }
 0x1e4   :  { %v729_v15 = vpack.c.bf16 %v597_v12, %v597_v12  ;;  %v598_v16 = vmul.f32 3.826981, %v710_v13 }
 0x1e6   :  { %618 = vst.msk [vmem:[#allocation5 + $0x10] sm:$0xf] %vm588_vm2, %v729_v15  ;;  %v730_v17 = vpack.c.bf16 %v598_v16, %v598_v16 }
 0x1e7   :  { %v475_v18 = vpop.f32.mrb[12].mxu1 }
 0x1e8   :  { %619 = vst.msk [vmem:[#allocation5 + $0x14] sm:$0xf] %vm588_vm2, %v730_v17  ;;  %v711_v19 = vadd.f32 -0.4578275, %v475_v18  ;;  %v827_v20 = vpop.f32.mrb[13].mxu1 }
 0x1e9   :  { %v478_v21 = vpop.f32.mrb[14].mxu1 }
 0x1ea   :  { %v599_v22 = vmul.f32 3.826981, %v711_v19  ;;  %v712_v23 = vadd.f32 -0.4578275, %v478_v21  ;;  %v828_v24 = vpop.f32.mrb[15].mxu1 }
 0x1ec   :  { %v731_v25 = vpack.c.bf16 %v599_v22, %v599_v22  ;;  %v600_v26 = vmul.f32 3.826981, %v712_v23 }
 0x1ee   :  { %620 = vst.msk [vmem:[#allocation5 + $0x18] sm:$0xf] %vm588_vm2, %v731_v25  ;;  %v732_v27 = vpack.c.bf16 %v600_v26, %v600_v26 }
 0x1ef   :  { %v516_v28 = vpop.f32.mrb[16].mxu1 }
 0x1f0   :  { %621 = vst.msk [vmem:[#allocation5 + $0x1c] sm:$0xf] %vm588_vm2, %v732_v27  ;;  %v717_v29 = vadd.f32 -0.40821072, %v516_v28  ;;  %v835_v30 = vpop.f32.mrb[17].mxu1 }
 0x1f1   :  { %v519_v31 = vpop.f32.mrb[18].mxu1 }
 0x1f2   :  { %v626_v32 = vmul.f32 3.6261168, %v717_v29  ;;  %v718_v33 = vadd.f32 -0.40821072, %v519_v31  ;;  %v836_v34 = vpop.f32.mrb[19].mxu1 }
 0x1f4   :  { %v733_v35 = vpack.c.bf16 %v626_v32, %v626_v32  ;;  %v627_v36 = vmul.f32 3.6261168, %v718_v33 }
 0x1f6   :  { %647 = vst.msk [vmem:[#allocation5 + $0x20] sm:$0xf] %vm588_vm2, %v733_v35  ;;  %v734_v37 = vpack.c.bf16 %v627_v36, %v627_v36 }
 0x1f7   :  { %v557_v38 = vpop.f32.mrb[20].mxu1 }
 0x1f8   :  { %648 = vst.msk [vmem:[#allocation5 + $0x24] sm:$0xf] %vm588_vm2, %v734_v37  ;;  %v719_v39 = vadd.f32 -0.40821072, %v557_v38  ;;  %v843_v40 = vpop.f32.mrb[21].mxu1 }
 0x1f9   :  { %v560_v41 = vpop.f32.mrb[22].mxu1 }
 0x1fa   :  { %v628_v42 = vmul.f32 3.6261168, %v719_v39  ;;  %v720_v43 = vadd.f32 -0.40821072, %v560_v41  ;;  %v844_v44 = vpop.f32.mrb[23].mxu1 }
 0x1fc   :  { %v735_v45 = vpack.c.bf16 %v628_v42, %v628_v42  ;;  %v629_v46 = vmul.f32 3.6261168, %v720_v43 }
 0x1fe   :  { %649 = vst.msk [vmem:[#allocation5 + $0x28] sm:$0xf] %vm588_vm2, %v735_v45  ;;  %v736_v47 = vpack.c.bf16 %v629_v46, %v629_v46 }
 0x200   :  { %650 = vst.msk [vmem:[#allocation5 + $0x2c] sm:$0xf] %vm588_vm2, %v736_v47 }
 0x201   :  { %899 = shalt.err (!%p896_p12)
}
 0x202   :  { %s900_s7 = scalar_lea.hbm %s1036_s3, 768 }
 0x203   :  { %p901_p13 = scmp.ne.s32.totalorder %s1036_s3, %s900_s7  ;;  %p904_p0 = scmp.lt.u32.totalorder %s900_s7, %s1036_s3 }
 0x205   :  { %p906_p1 = pnand %p904_p0, %p901_p13 }
 0x207   :  { %909 = shalt.err (!%p906_p1)
}
 0x208   :  { %662 = dma.vmem_to_hbm [thread:$0]  %s657_s30, 768, %s1036_s3, [#allocation4], %s915_s22, %s915_s22, %s916_s23  }
 0x209   :  { %912 = dma.done.wait [#allocation4], 768  }
 0x20a   :  { %913 = vsyncadd [#allocation4], 4294966528 }
 0x20b   :  { %666 = vsyncpa [#allocation3], 1 }
 0x20c   :  { %667 = vsyncpa [#allocation4], 1 }

// kernel: tpu_custom_call.1
= control target key start
LH: loop header
LB: loop body
LE: loop exit
PB: predicated region body
PF: predicated region fallthrough
CT: control target
= control target key end

     0   :  { %8 = vsyncpa [#allocation3], 0  ;;  %s1033_s0 = inlined_call_operand.hbm [shape: bf16[3,2,32,32], index: 0, kind: input, shape index: {}]   ;;  %s1034_s1 = inlined_call_operand.vmem [shape: bf16[32,16], index: 1, kind: input, shape index: {}]   ;;  %s1035_s2 = inlined_call_operand.vmem [shape: bf16[16,32], index: 2, kind: input, shape index: {}]   ;;  %s1036_s3 = inlined_call_operand.hbm [shape: bf16[3,2,16,16], index: 3, kind: output, shape index: {}]  }
   0x1   :  { %9 = vsyncpa [#allocation4], 0  ;;  %s914_s12 = smov [#allocation2]   ;;  %s866_s16 = scalar_lea.hbm %s1033_s0, 1536 }
   0x2   :  { %s15_s13 = sshll.u32 %s914_s12, 4  ;;  %p867_p0 = scmp.ne.s32.totalorder %s1033_s0, %s866_s16  ;;  %s16_s13 = int_to_ptr.vmem [resolvable:$true] %s15_s13 }
   0x3   :  { %p870_p1 = scmp.lt.u32.totalorder %s866_s16, %s1033_s0 }
   0x5   :  { %p872_p2 = pnand %p870_p1, %p867_p0 }
   0x7   :  { %875 = shalt.err (!%p872_p2)
}
   0x8   :  { %s876_s21 = scalar_lea.vmem %s16_s13, 1536  ;;  %p881_p4 = scmp.lt.s32.totalorder %s16_s13, %s16_s13 }
   0x9   :  { %p877_p3 = scmp.ne.s32.totalorder %s16_s13, %s876_s21  ;;  %p882_p5 = scmp.lt.s32.totalorder %s876_s21, %s876_s21 }
   0xb   :  { %p883_p6 = por %p882_p5, %p881_p4 }
   0xd   :  { %p884_p7 = pnand %p883_p6, %p877_p3 }
   0xf   :  { %887 = shalt.err (!%p884_p7)
}
  0x10   :  { %s915_s22 = smov 64   ;;  %s916_s23 = smov 4  }
  0x11   :  { %21 = dma.hbm_to_vmem [thread:$0]  %s1033_s0, 1536, %s16_s13, [#allocation3], %s915_s22, %s915_s22, %s916_s23  }
  0x12   :  { %910 = dma.done.wait [#allocation3], 1536  }
  0x13   :  { %911 = vsyncadd [#allocation3], 4294965760  ;;  %v851_v0 = vld [vmem:[%s1034_s1] sm:$0xff]   ;;  %v852_v1 = vld [vmem:[%s1034_s1 + $0x8] sm:$0xff]   ;;  %vm130_vm0 = vcmask 261120   ;;  %v917_v14 = vmov 0.0  }
  0x14   :  { %769 = vmatprep.subr.bf16.mxu0 %v851_v0  ;;  %v853_v2 = vld [vmem:[#allocation2] sm:$0xff]   ;;  %v854_v3 = vld [vmem:[#allocation2 + $0x8] sm:$0xff]   ;;  %v855_v4 = vld [vmem:[#allocation2 + $0x10] sm:$0xff]   ;;  %797 = vmatprep.subr.bf16.mxu1 %v917_v14  ;;  %vm918_vm1 = vmmov 0   ;;  %vm588_vm2 = vcmask 125952  }
  0x15   :  { %770 = vmatpush3.bf16.msra.mxu0 %v851_v0  ;;  %773 = vmatprep.mubr.msk.bf16.mxu0 %vm130_vm0, %v853_v2  ;;  %v856_v5 = vld [vmem:[#allocation2 + $0x18] sm:$0xff]   ;;  %v857_v6 = vld [vmem:[#allocation2 + $0x20] sm:$0xff]   ;;  %v858_v7 = vld [vmem:[#allocation2 + $0x28] sm:$0xff]  }
  0x16   :  { %771 = vmatprep.subr.bf16.mxu0 %v852_v1  ;;  %v859_v8 = vld [vmem:[#allocation2 + $0x30] sm:$0xff]   ;;  %v860_v9 = vld [vmem:[#allocation2 + $0x38] sm:$0xff]   ;;  %v861_v10 = vld [vmem:[#allocation2 + $0x40] sm:$0xff]   ;;  %801 = vmatprep.mubr.msk.bf16.mxu1 %vm918_vm1, %v917_v14 }
  0x17   :  { %v862_v11 = vld [vmem:[#allocation2 + $0x48] sm:$0xff]   ;;  %v863_v12 = vld [vmem:[#allocation2 + $0x50] sm:$0xff]   ;;  %v864_v13 = vld [vmem:[#allocation2 + $0x58] sm:$0xff]  }
  0x18   :  { %v865_v23 = vld [vmem:[%s1035_s2] sm:$0xff]   ;;  %s919_s2 = smov [#allocation5]  }
  0x19   :  { %772 = vmatpush3.bf16.msra.mxu0 %v852_v1  ;;  %s656_s30 = sshll.u32 %s919_s2, 4  ;;  %s657_s30 = int_to_ptr.vmem [resolvable:$true] %s656_s30 }
  0x1a   :  { %s888_s4 = scalar_lea.vmem %s657_s30, 768  ;;  %p893_p9 = scmp.lt.s32.totalorder %s657_s30, %s657_s30 }
  0x1b   :  { %p889_p8 = scmp.ne.s32.totalorder %s657_s30, %s888_s4  ;;  %p894_p10 = scmp.lt.s32.totalorder %s888_s4, %s888_s4 }
  0x1c   :  { %774 = vmatmul.mubr.msk.bf16.vlgmr.msra.gmra.mrb[0].mxu0 %vm130_vm0, %v854_v3 }
  0x1d   :  { %777 = vmatprep.mubr.msk.bf16.mxu0 %vm130_vm0, %v855_v4  ;;  %p895_p11 = por %p894_p10, %p893_p9 }
  0x1f   :  { %p896_p12 = pnand %p895_p11, %p889_p8 }
  0x24   :  { %778 = vmatmul.mubr.msk.bf16.gmra.mrb[4].mxu0 %vm130_vm0, %v856_v5 }
  0x25   :  { %781 = vmatprep.mubr.msk.bf16.mxu0 %vm130_vm0, %v857_v6 }
  0x2c   :  { %782 = vmatmul.mubr.msk.bf16.gmra.mrb[8].mxu0 %vm130_vm0, %v858_v7 }
  0x2d   :  { %785 = vmatprep.mubr.msk.bf16.mxu0 %vm130_vm0, %v859_v8 }
  0x34   :  { %786 = vmatmul.mubr.msk.bf16.gmra.mrb[12].mxu0 %vm130_vm0, %v860_v9 }
  0x35   :  { %789 = vmatprep.mubr.msk.bf16.mxu0 %vm130_vm0, %v861_v10 }
  0x3c   :  { %790 = vmatmul.mubr.msk.bf16.gmra.mrb[16].mxu0 %vm130_vm0, %v862_v11 }
  0x3d   :  { %793 = vmatprep.mubr.msk.bf16.mxu0 %vm130_vm0, %v863_v12 }
  0x44   :  { %794 = vmatmul.mubr.msk.bf16.gmra.mrb[20].mxu0 %vm130_vm0, %v864_v13 }
  0xef   :  { %v775_v15 = vpop.f32.mrb[0].mxu0 }
  0xf0   :  { %v201_v16 = vpop.f32.mrb[1].mxu0 }
  0xf1   :  { %v776_v17 = vpop.f32.mrb[2].mxu0 }
  0xf2   :  { %v297_v18 = vpack.c.bf16 %v776_v17, %v775_v15  ;;  %v204_v19 = vpop.f32.mrb[3].mxu0 }
  0xf3   :  { %v296_v20 = vpack.c.bf16 %v204_v19, %v201_v16 }
  0xf5   :  { %798 = vmatpush3.bf16.msra.mxu1 %v296_v20 }
  0xf6   :  { %799 = vmatprep.subr.bf16.mxu1 %v917_v14 }
  0xf7   :  { %v779_v21 = vpop.f32.mrb[4].mxu0 }
  0xf8   :  { %v217_v22 = vpop.f32.mrb[5].mxu0 }
  0xf9   :  { %v780_v24 = vpop.f32.mrb[6].mxu0  ;;  %800 = vmatpush3.bf16.msra.mxu1 %v297_v18 }
  0xfa   :  { %v299_v25 = vpack.c.bf16 %v780_v24, %v779_v21  ;;  %v220_v26 = vpop.f32.mrb[7].mxu0  ;;  %805 = vmatprep.subr.bf16.mxu1 %v917_v14 }
  0xfb   :  { %v298_v27 = vpack.c.bf16 %v220_v26, %v217_v22 }
  0xfc   :  { %802 = vmatmul.mubr.msk.bf16.vlgmr.msra.gmra.mrb[0].mxu1 %vm130_vm0, %v865_v23 }
  0xfd   :  { %806 = vmatpush3.bf16.msra.mxu1 %v298_v27  ;;  %809 = vmatprep.mubr.msk.bf16.mxu1 %vm918_vm1, %v917_v14 }
  0xfe   :  { %807 = vmatprep.subr.bf16.mxu1 %v917_v14 }
  0xff   :  { %v783_v28 = vpop.f32.mrb[8].mxu0 }
 0x100   :  { %v233_v29 = vpop.f32.mrb[9].mxu0 }
 0x101   :  { %v784_v30 = vpop.f32.mrb[10].mxu0  ;;  %808 = vmatpush3.bf16.msra.mxu1 %v299_v25 }
 0x102   :  { %v301_v31 = vpack.c.bf16 %v784_v30, %v783_v28  ;;  %v236_v32 = vpop.f32.mrb[11].mxu0  ;;  %813 = vmatprep.subr.bf16.mxu1 %v917_v14 }
 0x103   :  { %v300_v33 = vpack.c.bf16 %v236_v32, %v233_v29 }
 0x104   :  { %810 = vmatmul.mubr.msk.bf16.vlgmr.msra.gmra.mrb[4].mxu1 %vm130_vm0, %v865_v23 }
 0x105   :  { %814 = vmatpush3.bf16.msra.mxu1 %v300_v33  ;;  %817 = vmatprep.mubr.msk.bf16.mxu1 %vm918_vm1, %v917_v14 }
 0x106   :  { %815 = vmatprep.subr.bf16.mxu1 %v917_v14 }
 0x107   :  { %v787_v34 = vpop.f32.mrb[12].mxu0 }
 0x108   :  { %v249_v35 = vpop.f32.mrb[13].mxu0 }
 0x109   :  { %v788_v36 = vpop.f32.mrb[14].mxu0  ;;  %816 = vmatpush3.bf16.msra.mxu1 %v301_v31 }
 0x10a   :  { %v303_v37 = vpack.c.bf16 %v788_v36, %v787_v34  ;;  %v252_v38 = vpop.f32.mrb[15].mxu0  ;;  %821 = vmatprep.subr.bf16.mxu1 %v917_v14 }
 0x10b   :  { %v302_v39 = vpack.c.bf16 %v252_v38, %v249_v35 }
 0x10c   :  { %818 = vmatmul.mubr.msk.bf16.vlgmr.msra.gmra.mrb[8].mxu1 %vm130_vm0, %v865_v23 }
 0x10d   :  { %822 = vmatpush3.bf16.msra.mxu1 %v302_v39  ;;  %825 = vmatprep.mubr.msk.bf16.mxu1 %vm918_vm1, %v917_v14 }
 0x10e   :  { %823 = vmatprep.subr.bf16.mxu1 %v917_v14 }
 0x10f   :  { %v791_v40 = vpop.f32.mrb[16].mxu0 }
 0x110   :  { %v265_v41 = vpop.f32.mrb[17].mxu0 }
 0x111   :  { %v792_v42 = vpop.f32.mrb[18].mxu0  ;;  %824 = vmatpush3.bf16.msra.mxu1 %v303_v37 }
 0x112   :  { %v305_v43 = vpack.c.bf16 %v792_v42, %v791_v40  ;;  %v268_v44 = vpop.f32.mrb[19].mxu0  ;;  %829 = vmatprep.subr.bf16.mxu1 %v917_v14 }
 0x113   :  { %v304_v45 = vpack.c.bf16 %v268_v44, %v265_v41 }
 0x114   :  { %826 = vmatmul.mubr.msk.bf16.vlgmr.msra.gmra.mrb[12].mxu1 %vm130_vm0, %v865_v23 }
 0x115   :  { %830 = vmatpush3.bf16.msra.mxu1 %v304_v45  ;;  %833 = vmatprep.mubr.msk.bf16.mxu1 %vm918_vm1, %v917_v14 }
 0x116   :  { %831 = vmatprep.subr.bf16.mxu1 %v917_v14 }
 0x117   :  { %v795_v46 = vpop.f32.mrb[20].mxu0 }
 0x118   :  { %v281_v47 = vpop.f32.mrb[21].mxu0 }
 0x119   :  { %v796_v48 = vpop.f32.mrb[22].mxu0  ;;  %832 = vmatpush3.bf16.msra.mxu1 %v305_v43 }
 0x11a   :  { %v307_v49 = vpack.c.bf16 %v796_v48, %v795_v46  ;;  %v284_v50 = vpop.f32.mrb[23].mxu0  ;;  %837 = vmatprep.subr.bf16.mxu1 %v917_v14 }
 0x11b   :  { %v306_v51 = vpack.c.bf16 %v284_v50, %v281_v47 }
 0x11c   :  { %834 = vmatmul.mubr.msk.bf16.vlgmr.msra.gmra.mrb[16].mxu1 %vm130_vm0, %v865_v23 }
 0x11d   :  { %838 = vmatpush3.bf16.msra.mxu1 %v306_v51  ;;  %841 = vmatprep.mubr.msk.bf16.mxu1 %vm918_vm1, %v917_v14 }
 0x11e   :  { %839 = vmatprep.subr.bf16.mxu1 %v917_v14 }
 0x121   :  { %840 = vmatpush3.bf16.msra.mxu1 %v307_v49 }
 0x124   :  { %842 = vmatmul.mubr.msk.bf16.vlgmr.msra.gmra.mrb[20].mxu1 %vm130_vm0, %v865_v23 }
 0x1cf   :  { %v352_v52 = vpop.f32.mrb[0].mxu1 }
 0x1d0   :  { %v701_v53 = vadd.f32 -0.48145467, %v352_v52  ;;  %v803_v54 = vpop.f32.mrb[1].mxu1 }
 0x1d1   :  { %v355_v55 = vpop.f32.mrb[2].mxu1 }
 0x1d2   :  { %v568_v56 = vmul.f32 3.7225988, %v701_v53  ;;  %v702_v57 = vadd.f32 -0.48145467, %v355_v55  ;;  %v804_v58 = vpop.f32.mrb[3].mxu1 }
 0x1d4   :  { %v725_v59 = vpack.c.bf16 %v568_v56, %v568_v56  ;;  %v569_v60 = vmul.f32 3.7225988, %v702_v57 }
 0x1d6   :  { %589 = vst.msk [vmem:[#allocation5] sm:$0xf] %vm588_vm2, %v725_v59  ;;  %v726_v61 = vpack.c.bf16 %v569_v60, %v569_v60 }
 0x1d7   :  { %v393_v62 = vpop.f32.mrb[4].mxu1 }
 0x1d8   :  { %590 = vst.msk [vmem:[#allocation5 + $0x4] sm:$0xf] %vm588_vm2, %v726_v61  ;;  %v703_v63 = vadd.f32 -0.48145467, %v393_v62  ;;  %v811_v0 = vpop.f32.mrb[5].mxu1 }
 0x1d9   :  { %v396_v1 = vpop.f32.mrb[6].mxu1 }
 0x1da   :  { %v570_v2 = vmul.f32 3.7225988, %v703_v63  ;;  %v704_v3 = vadd.f32 -0.48145467, %v396_v1  ;;  %v812_v4 = vpop.f32.mrb[7].mxu1 }
 0x1dc   :  { %v727_v5 = vpack.c.bf16 %v570_v2, %v570_v2  ;;  %v571_v6 = vmul.f32 3.7225988, %v704_v3 }
 0x1de   :  { %591 = vst.msk [vmem:[#allocation5 + $0x8] sm:$0xf] %vm588_vm2, %v727_v5  ;;  %v728_v7 = vpack.c.bf16 %v571_v6, %v571_v6 }
 0x1df   :  { %v434_v8 = vpop.f32.mrb[8].mxu1 }
 0x1e0   :  { %592 = vst.msk [vmem:[#allocation5 + $0xc] sm:$0xf] %vm588_vm2, %v728_v7  ;;  %v709_v9 = vadd.f32 -0.4578275, %v434_v8  ;;  %v819_v10 = vpop.f32.mrb[9].mxu1 }
 0x1e1   :  { %v437_v11 = vpop.f32.mrb[10].mxu1 }
 0x1e2   :  { %v597_v12 = vmul.f32 3.826981, %v709_v9  ;;  %v710_v13 = vadd.f32 -0.4578275, %v437_v11  ;;  %v820_v14 = vpop.f32.mrb[11].mxu1 }
 0x1e4   :  { %v729_v15 = vpack.c.bf16 %v597_v12, %v597_v12  ;;  %v598_v16 = vmul.f32 3.826981, %v710_v13 }
 0x1e6   :  { %618 = vst.msk [vmem:[#allocation5 + $0x10] sm:$0xf] %vm588_vm2, %v729_v15  ;;  %v730_v17 = vpack.c.bf16 %v598_v16, %v598_v16 }
 0x1e7   :  { %v475_v18 = vpop.f32.mrb[12].mxu1 }
 0x1e8   :  { %619 = vst.msk [vmem:[#allocation5 + $0x14] sm:$0xf] %vm588_vm2, %v730_v17  ;;  %v711_v19 = vadd.f32 -0.4578275, %v475_v18  ;;  %v827_v20 = vpop.f32.mrb[13].mxu1 }
 0x1e9   :  { %v478_v21 = vpop.f32.mrb[14].mxu1 }
 0x1ea   :  { %v599_v22 = vmul.f32 3.826981, %v711_v19  ;;  %v712_v23 = vadd.f32 -0.4578275, %v478_v21  ;;  %v828_v24 = vpop.f32.mrb[15].mxu1 }
 0x1ec   :  { %v731_v25 = vpack.c.bf16 %v599_v22, %v599_v22  ;;  %v600_v26 = vmul.f32 3.826981, %v712_v23 }
 0x1ee   :  { %620 = vst.msk [vmem:[#allocation5 + $0x18] sm:$0xf] %vm588_vm2, %v731_v25  ;;  %v732_v27 = vpack.c.bf16 %v600_v26, %v600_v26 }
 0x1ef   :  { %v516_v28 = vpop.f32.mrb[16].mxu1 }
 0x1f0   :  { %621 = vst.msk [vmem:[#allocation5 + $0x1c] sm:$0xf] %vm588_vm2, %v732_v27  ;;  %v717_v29 = vadd.f32 -0.40821072, %v516_v28  ;;  %v835_v30 = vpop.f32.mrb[17].mxu1 }
 0x1f1   :  { %v519_v31 = vpop.f32.mrb[18].mxu1 }
 0x1f2   :  { %v626_v32 = vmul.f32 3.6261168, %v717_v29  ;;  %v718_v33 = vadd.f32 -0.40821072, %v519_v31  ;;  %v836_v34 = vpop.f32.mrb[19].mxu1 }
 0x1f4   :  { %v733_v35 = vpack.c.bf16 %v626_v32, %v626_v32  ;;  %v627_v36 = vmul.f32 3.6261168, %v718_v33 }
 0x1f6   :  { %647 = vst.msk [vmem:[#allocation5 + $0x20] sm:$0xf] %vm588_vm2, %v733_v35  ;;  %v734_v37 = vpack.c.bf16 %v627_v36, %v627_v36 }
 0x1f7   :  { %v557_v38 = vpop.f32.mrb[20].mxu1 }
 0x1f8   :  { %648 = vst.msk [vmem:[#allocation5 + $0x24] sm:$0xf] %vm588_vm2, %v734_v37  ;;  %v719_v39 = vadd.f32 -0.40821072, %v557_v38  ;;  %v843_v40 = vpop.f32.mrb[21].mxu1 }
 0x1f9   :  { %v560_v41 = vpop.f32.mrb[22].mxu1 }
 0x1fa   :  { %v628_v42 = vmul.f32 3.6261168, %v719_v39  ;;  %v720_v43 = vadd.f32 -0.40821072, %v560_v41  ;;  %v844_v44 = vpop.f32.mrb[23].mxu1 }
 0x1fc   :  { %v735_v45 = vpack.c.bf16 %v628_v42, %v628_v42  ;;  %v629_v46 = vmul.f32 3.6261168, %v720_v43 }
 0x1fe   :  { %649 = vst.msk [vmem:[#allocation5 + $0x28] sm:$0xf] %vm588_vm2, %v735_v45  ;;  %v736_v47 = vpack.c.bf16 %v629_v46, %v629_v46 }
 0x200   :  { %650 = vst.msk [vmem:[#allocation5 + $0x2c] sm:$0xf] %vm588_vm2, %v736_v47 }
 0x201   :  { %899 = shalt.err (!%p896_p12)
}
 0x202   :  { %s900_s7 = scalar_lea.hbm %s1036_s3, 768 }
 0x203   :  { %p901_p13 = scmp.ne.s32.totalorder %s1036_s3, %s900_s7  ;;  %p904_p0 = scmp.lt.u32.totalorder %s900_s7, %s1036_s3 }
 0x205   :  { %p906_p1 = pnand %p904_p0, %p901_p13 }
 0x207   :  { %909 = shalt.err (!%p906_p1)
}
 0x208   :  { %662 = dma.vmem_to_hbm [thread:$0]  %s657_s30, 768, %s1036_s3, [#allocation4], %s915_s22, %s915_s22, %s916_s23  }
 0x209   :  { %912 = dma.done.wait [#allocation4], 768  }
 0x20a   :  { %913 = vsyncadd [#allocation4], 4294966528 }
 0x20b   :  { %666 = vsyncpa [#allocation3], 1 }
 0x20c   :  { %667 = vsyncpa [#allocation4], 1 }

</bundles_post_ra>
